<compile_context>
chip_gen: v7x
topology: tpu7x:2x2x1
jax: 0.10.0
libtpu: 0.0.40
codegen_flags: <defaults>
</compile_context>

<pallas_src>
import numpy as np
import jax
import jax.numpy as jnp
from jax.experimental import pallas as pl
from jax.experimental.pallas import tpu as pltpu

WPAD = 128  # lane-dense padded width for all hidden activations


# ----------------------- parameter construction ----------------------------

def _init_conv(key, cout, cin, k):
    bound = 1.0 / float(np.sqrt(cin * k))
    k1, k2 = jax.random.split(key)
    w = jax.random.uniform(k1, (cout, cin, k), jnp.float32, -bound, bound)
    b = jax.random.uniform(k2, (cout,), jnp.float32, -bound, bound)
    return w, b


def _init_linear(key, nin, nout):
    bound = 1.0 / float(np.sqrt(nin))
    k1, k2 = jax.random.split(key)
    w = jax.random.uniform(k1, (nin, nout), jnp.float32, -bound, bound)
    b = jax.random.uniform(k2, (nout,), jnp.float32, -bound, bound)
    return w, b


def build_cnn12b_params(key, K, in_channels, seq_len, output_dim=1):
    """Replicates CNN_12b.__init__ shape bookkeeping (cfg.gpu_preproc=False)."""
    c = in_channels // 2
    _win, f0 = K[0]
    fin, fout = c, f0
    L = seq_len
    i = 1
    stages = []
    keys = iter(jax.random.split(key, 64))
    while isinstance(K[i], (list, tuple)):
        k = K[i]; i += 1
        if k[0] > 0:  # Conv1d(+ReLU) per branch
            w1, b1 = _init_conv(next(keys), fout, fin, k[0])
            w2, b2 = _init_conv(next(keys), fout, fin, k[0])
            Lout = (L - k[0]) // k[1] + 1
            stages.append(dict(type="conv", k=k[0], s=k[1], Lin=L, Lout=Lout,
                               cin=fin, cout=fout, w1=w1, b1=b1, w2=w2, b2=b2))
            L = Lout
            fin, fout = fout, fout * 2
        else:          # MaxPool1d (no ReLU)
            Lout = (L - (-k[0])) // k[1] + 1
            stages.append(dict(type="pool", k=-k[0], s=k[1], Lin=L, Lout=Lout))
            L = Lout
            fin, fout = fout // 2, fout
    f = fin
    assert L == 1, f"config must collapse length to 1 for view(-1, f); got L={L}"

    merged = False
    n1 = f
    while i < len(K):
        n2 = K[i]; i += 1
        if n2 < 0 and not merged:
            n1, n2, merged = n1 * 2, abs(n2), True
        if merged:
            w, b = _init_linear(next(keys), n1, n2)
            stages.append(dict(type="lin_merged", n_in=n1, n_out=n2, w=w, b=b))
        else:
            w1, b1 = _init_linear(next(keys), n1, n2)
            w2, b2 = _init_linear(next(keys), n1, n2)
            stages.append(dict(type="lin_diag", n_in=n1, n_out=n2,
                               w1=w1, b1=b1, w2=w2, b2=b2))
        n1 = n2
    if not merged:
        n1 = n1 * 2
    w, b = _init_linear(next(keys), n1, output_dim)
    stages.append(dict(type="lin_final", n_in=n1, n_out=output_dim, w=w, b=b))

    return dict(c=c, f=f, stages=stages, in_channels=in_channels,
                seq_len=seq_len, output_dim=output_dim)


# --------- packing both branches into ONE stacked bf16 weight slab ----------

def pack_fused(params):
    """Build (N,128,128) bf16 weight slab, (8,128) f32 bias slab and a static
    program describing the fused kernel (block-diagonal two-branch layout)."""
    stages = params["stages"]
    st0 = stages[0]
    assert st0["type"] == "conv", "first stage must be a conv (im2col'd in wrapper)"
    k1, cin0, cout0 = st0["k"], st0["cin"], st0["cout"]
    assert 2 * cin0 * k1 <= WPAD and 2 * cout0 <= WPAD

    slots, biases, prog = [], [], []

    # conv1: single im2col matmul slab. Row index = branch*cin*k + ci*k + kk.
    W0 = np.zeros((WPAD, WPAD), np.float32)
    w1 = np.asarray(st0["w1"]).reshape(cout0, cin0 * k1)   # (cout, cin*k)
    w2 = np.asarray(st0["w2"]).reshape(cout0, cin0 * k1)
    W0[0:cin0 * k1, 0:cout0] = w1.T
    W0[cin0 * k1:2 * cin0 * k1, cout0:2 * cout0] = w2.T
    b0 = np.zeros((WPAD,), np.float32)
    b0[0:cout0] = np.asarray(st0["b1"]); b0[cout0:2 * cout0] = np.asarray(st0["b2"])
    slots.append(W0); biases.append(b0)
    prog.append(dict(op="conv1", Lout=st0["Lout"], slot=0, bias=0))

    for st in stages[1:]:
        t = st["type"]
        if t == "pool":
            prog.append(dict(op="pool", k=st["k"], s=st["s"], Lout=st["Lout"]))
        elif t == "conv":
            k, cin, cout = st["k"], st["cin"], st["cout"]
            assert 2 * cin <= WPAD and 2 * cout <= WPAD
            slot0 = len(slots)
            w1 = np.asarray(st["w1"]); w2 = np.asarray(st["w2"])
            for kk in range(k):        # one (128,128) slot per tap (K-stacked in-kernel)
                Wk = np.zeros((WPAD, WPAD), np.float32)
                Wk[0:cin, 0:cout] = w1[:, :, kk].T
                Wk[cin:2 * cin, cout:2 * cout] = w2[:, :, kk].T
                slots.append(Wk)
            bb = np.zeros((WPAD,), np.float32)
            bb[0:cout] = np.asarray(st["b1"]); bb[cout:2 * cout] = np.asarray(st["b2"])
            bidx = len(biases); biases.append(bb)
            prog.append(dict(op="conv", k=k, s=st["s"], Lout=st["Lout"],
                             slot=slot0, bias=bidx))
        elif t == "lin_diag":
            n_in, n_out = st["n_in"], st["n_out"]
            assert 2 * n_in <= WPAD and 2 * n_out <= WPAD
            Wk = np.zeros((WPAD, WPAD), np.float32)
            Wk[0:n_in, 0:n_out] = np.asarray(st["w1"])
            Wk[n_in:2 * n_in, n_out:2 * n_out] = np.asarray(st["w2"])
            bb = np.zeros((WPAD,), np.float32)
            bb[0:n_out] = np.asarray(st["b1"]); bb[n_out:2 * n_out] = np.asarray(st["b2"])
            sidx = len(slots); slots.append(Wk)
            bidx = len(biases); biases.append(bb)
            prog.append(dict(op="lin", slot=sidx, bias=bidx, relu=True))
        else:  # lin_merged / lin_final (merged input = [h1 | h2] lanes already)
            n_in, n_out = st["n_in"], st["n_out"]
            assert n_in <= WPAD and n_out <= WPAD
            Wk = np.zeros((WPAD, WPAD), np.float32)
            Wk[0:n_in, 0:n_out] = np.asarray(st["w"])
            bb = np.zeros((WPAD,), np.float32)
            bb[0:n_out] = np.asarray(st["b"])
            sidx = len(slots); slots.append(Wk)
            bidx = len(biases); biases.append(bb)
            prog.append(dict(op="lin", slot=sidx, bias=bidx,
                             relu=(t == "lin_merged")))

    w_slab = jnp.asarray(np.stack(slots, axis=0), dtype=jnp.bfloat16)  # (N,128,128)
    nb = len(biases)
    nb_pad = ((nb + 7) // 8) * 8
    b_arr = np.zeros((nb_pad, WPAD), np.float32)
    b_arr[:nb] = np.stack(biases, axis=0)
    b_slab = jnp.asarray(b_arr)                                        # (8,128) f32
    return prog, w_slab, b_slab


# --------------------------- fused Pallas kernel ----------------------------

def make_fused_call(prog, n_slots, n_bias_rows, BT, Lout1, n_grid):
    LB = Lout1 * BT   # rows of the im2col slab per batch tile

    def kernel(x_ref, w_ref, b_ref, o_ref):
        bias = b_ref[...]                                   # (8,128) f32

        def mm(a, slot):
            return jnp.dot(a.astype(jnp.bfloat16), w_ref[slot],
                           preferred_element_type=jnp.float32)

        # ---- conv1 (+ReLU): all output positions and the batch tile in ONE matmul.
        st = prog[0]
        a = jnp.maximum(mm(x_ref[...], st["slot"])          # (Lout1*BT, 128)
                        + bias[st["bias"]:st["bias"] + 1], 0.0)

        for st in prog[1:]:
            if st["op"] == "pool":                          # MaxPool1d, no ReLU
                outs = []
                for p in range(st["Lout"]):
                    r0 = (p * st["s"]) * BT
                    m = a[r0:r0 + BT, :]
                    for kk in range(1, st["k"]):
                        rk = (p * st["s"] + kk) * BT
                        m = jnp.maximum(m, a[rk:rk + BT, :])
                    outs.append(m)
                a = outs[0] if st["Lout"] == 1 else jnp.concatenate(outs, axis=0)
            elif st["op"] == "conv":                        # taps fused into MXU K dim
                wk = jnp.concatenate([w_ref[st["slot"] + kk] for kk in range(st["k"])],
                                     axis=0)                # (k*128, 128) bf16
                bk = bias[st["bias"]:st["bias"] + 1]
                outs = []
                for p in range(st["Lout"]):                 # Lout==1 in this config
                    z = jnp.concatenate(
                        [a[(p * st["s"] + kk) * BT:(p * st["s"] + kk + 1) * BT, :]
                         for kk in range(st["k"])], axis=-1)      # (BT, k*128)
                    outs.append(jnp.maximum(
                        jnp.dot(z.astype(jnp.bfloat16), wk,
                                preferred_element_type=jnp.float32) + bk, 0.0))
                a = outs[0] if st["Lout"] == 1 else jnp.concatenate(outs, axis=0)
            else:                                           # fully connected
                h = mm(a, st["slot"]) + bias[st["bias"]:st["bias"] + 1]
                a = jnp.maximum(h, 0.0) if st["relu"] else h

        o_ref[...] = a                                      # (BT, 128), lane-dense

    return pl.pallas_call(
        kernel,
        grid=(n_grid,),
        in_specs=[
            pl.BlockSpec((LB, WPAD), lambda g: (g, 0)),              # im2col input tile
            pl.BlockSpec((n_slots, WPAD, WPAD), lambda g: (0, 0, 0)),  # all weights (bf16)
            pl.BlockSpec((n_bias_rows, WPAD), lambda g: (0, 0)),       # all biases (f32)
        ],
        out_specs=pl.BlockSpec((BT, WPAD), lambda g: (g, 0)),
        out_shape=jax.ShapeDtypeStruct((n_grid * BT, WPAD), jnp.float32),
        compiler_params=pltpu.CompilerParams(
            dimension_semantics=("parallel",)),   # both TCs on v7x; no-op on v5e/v6e
    )


def make_cnn12b_forward(params, batch, batch_tile=8):
    assert batch % batch_tile == 0, "batch must be a multiple of batch_tile"
    prog, w_slab, b_slab = pack_fused(params)
    st0 = params["stages"][0]
    c, k1, s1, Lout1 = params["c"], st0["k"], st0["s"], st0["Lout"]
    n_grid = batch // batch_tile
    call = make_fused_call(prog, w_slab.shape[0], b_slab.shape[0],
                           batch_tile, Lout1, n_grid)
    out_dim = params["output_dim"]
    ck = c * k1

    @jax.jit
    def forward(x):
        x = x.astype(jnp.float32)
        B = x.shape[0]
        # Wrapper-side im2col for conv1, folded into the layout transform:
        # rows ordered (tile g, position l, sample b); cols = [branch1 | branch2].
        wins = jnp.stack([x[:, :, l * s1:l * s1 + k1] for l in range(Lout1)],
                         axis=1)                                  # (B, L1, 2c, k1)
        f1 = wins[:, :, :c, :].reshape(B, Lout1, ck)
        f2 = wins[:, :, c:, :].reshape(B, Lout1, ck)
        cols = jnp.concatenate([f1, f2], axis=-1)                  # (B, L1, 2ck)
        cols = jnp.pad(cols, ((0, 0), (0, 0), (0, WPAD - 2 * ck)))
        cols = cols.reshape(n_grid, batch_tile, Lout1, WPAD).transpose(0, 2, 1, 3)
        cols = cols.reshape(n_grid * Lout1 * batch_tile, WPAD)
        out = call(cols, w_slab, b_slab)                           # (B, 128) lane-dense
        return out[:, :out_dim]

    return forward


# -------------------- pure-JAX reference (for validation) -------------------

def reference_forward(params, x):
    """Pure-JAX/XLA reference mirroring CNN_12b.forward (eval mode, f32)."""
    c, f = params["c"], params["f"]
    x = x.astype(jnp.float32)
    x1, x2 = x[:, :c, :], x[:, c:, :]

    def conv1d(xb, w, b, s):
        Cout, _, K = w.shape
        L = xb.shape[-1]
        Lout = (L - K) // s + 1
        cols = jnp.stack([xb[:, :, l * s:l * s + K] for l in range(Lout)], axis=2)
        y = jnp.einsum("bclk,ock->bol", cols, w,
                       precision=jax.lax.Precision.HIGHEST)
        return y + b[None, :, None]

    def pool1d(xb, k, s):
        L = xb.shape[-1]
        Lout = (L - k) // s + 1
        cols = jnp.stack([xb[:, :, l * s:l * s + k] for l in range(Lout)], axis=2)
        return jnp.max(cols, axis=-1)

    def run_branch(xb, wkey, bkey):
        for st in params["stages"]:
            if st["type"] == "conv":
                xb = jax.nn.relu(conv1d(xb, st[wkey], st[bkey], st["s"]))
            elif st["type"] == "pool":
                xb = pool1d(xb, st["k"], st["s"])
        return xb.reshape(-1, f)

    h1 = run_branch(x1, "w1", "b1")
    h2 = run_branch(x2, "w2", "b2")
    for st in params["stages"]:
        if st["type"] == "lin_diag":
            h1 = jax.nn.relu(h1 @ st["w1"] + st["b1"])
            h2 = jax.nn.relu(h2 @ st["w2"] + st["b2"])
    h = jnp.concatenate([h1, h2], axis=1)
    tail = [st for st in params["stages"] if st["type"] in ("lin_merged", "lin_final")]
    for idx, st in enumerate(tail):
        h = h @ st["w"] + st["b"]
        if idx + 1 < len(tail):
            h = jax.nn.relu(h)
    return h


# ----------------------------------- main ------------------------------------

if __name__ == "__main__":
    key = jax.random.PRNGKey(0)
    k_param, k_data = jax.random.split(key)

    # cfg.cnn (win/f header, conv/pool specs, linear widths) and input geometry
    K = [(5, 8), (5, 2), (-2, 2), (3, 1), 32, -24]
    # Batch raised to 16 (perf review): fills f32 sublane groups (tile=8) and
    # gives 2 "parallel" grid steps so both v7x TensorCores are used.
    B, C, T = 16, 8, 16

    params = build_cnn12b_params(k_param, K, in_channels=C, seq_len=T,
                                 output_dim=1)
    forward = make_cnn12b_forward(params, batch=B, batch_tile=8)

    x = jax.random.normal(k_data, (B, C, T), dtype=jnp.float32)

    out = jax.block_until_ready(forward(x))
    assert out.shape == (B, 1), out.shape

    ref = jax.block_until_ready(reference_forward(params, x))
    # Weights are stored/multiplied in bf16 (per perf review) with f32
    # accumulation; compare against the f32 HIGHEST-precision reference at a
    # tolerance consistent with bf16 mixed precision.
    np.testing.assert_allclose(np.asarray(out), np.asarray(ref),
                               rtol=2e-2, atol=2e-2)

    print("KERNEL_OK")
</pallas_src>

<mosaic_0001>
module attributes {stable_mosaic.version = 11 : i64} {
  func.func @kernel(%arg0: i32, %arg1: memref<48x128xf32, #tpu.memory_space<vmem>>, %arg2: memref<7x128x128xbf16, #tpu.memory_space<vmem>>, %arg3: memref<8x128xf32, #tpu.memory_space<vmem>>, %arg4: memref<8x128xf32, #tpu.memory_space<vmem>>) attributes {dimension_semantics = [#tpu.dimension_semantics<parallel>], iteration_bounds = array<i64: 2>, scalar_prefetch = 0 : i64, scratch_operands = 0 : i64, tpu.core_type = #tpu.core_type<tc>, window_params = [{transform_indices = @transform_0, window_bounds = array<i64: 48, 128>}, {pipeline_mode = #tpu.pipeline_mode<synchronous>, transform_indices = @transform_1, window_bounds = array<i64: 7, 128, 128>}, {pipeline_mode = #tpu.pipeline_mode<synchronous>, transform_indices = @transform_2, window_bounds = array<i64: 8, 128>}, {transform_indices = @transform_3, window_bounds = array<i64: 8, 128>}]} {
    %c0 = arith.constant 0 : index
    %c0_0 = arith.constant 0 : index
    %0 = vector.load %arg3[%c0, %c0_0] : memref<8x128xf32, #tpu.memory_space<vmem>>, vector<8x128xf32>
    %c0_1 = arith.constant 0 : index
    %c0_2 = arith.constant 0 : index
    %1 = vector.load %arg1[%c0_1, %c0_2] : memref<48x128xf32, #tpu.memory_space<vmem>>, vector<48x128xf32>
    %2 = arith.truncf %1 : vector<48x128xf32> to vector<48x128xbf16>
    %c0_3 = arith.constant 0 : index
    %c0_4 = arith.constant 0 : index
    %c0_5 = arith.constant 0 : index
    %3 = vector.load %arg2[%c0_3, %c0_4, %c0_5] : memref<7x128x128xbf16, #tpu.memory_space<vmem>>, vector<1x128x128xbf16>
    %4 = vector.shape_cast %3 : vector<1x128x128xbf16> to vector<128x128xbf16>
    %cst = arith.constant dense<0.000000e+00> : vector<48x128xf32>
    %5 = tpu.matmul %2, %4, %cst {dimension_numbers = #tpu.dot_dimension_numbers<[1], [0], [0], [1], [0, 0, 1, 1], [], []>} : vector<48x128xbf16>, vector<128x128xbf16>, vector<48x128xf32> -> vector<48x128xf32>
    %6 = vector.extract_strided_slice %0 {offsets = [0, 0], sizes = [1, 128], strides = [1, 1]} : vector<8x128xf32> to vector<1x128xf32>
    %7 = vector.broadcast %6 : vector<1x128xf32> to vector<48x128xf32>
    %8 = arith.addf %5, %7 : vector<48x128xf32>
    %cst_6 = arith.constant 0.000000e+00 : f32
    %9 = vector.broadcast %cst_6 : f32 to vector<48x128xf32>
    %10 = arith.maximumf %8, %9 : vector<48x128xf32>
    %11 = vector.extract_strided_slice %10 {offsets = [0, 0], sizes = [8, 128], strides = [1, 1]} : vector<48x128xf32> to vector<8x128xf32>
    %12 = vector.extract_strided_slice %10 {offsets = [8, 0], sizes = [8, 128], strides = [1, 1]} : vector<48x128xf32> to vector<8x128xf32>
    %13 = arith.maximumf %11, %12 : vector<8x128xf32>
    %14 = vector.extract_strided_slice %10 {offsets = [16, 0], sizes = [8, 128], strides = [1, 1]} : vector<48x128xf32> to vector<8x128xf32>
    %15 = vector.extract_strided_slice %10 {offsets = [24, 0], sizes = [8, 128], strides = [1, 1]} : vector<48x128xf32> to vector<8x128xf32>
    %16 = arith.maximumf %14, %15 : vector<8x128xf32>
    %17 = vector.extract_strided_slice %10 {offsets = [32, 0], sizes = [8, 128], strides = [1, 1]} : vector<48x128xf32> to vector<8x128xf32>
    %18 = vector.extract_strided_slice %10 {offsets = [40, 0], sizes = [8, 128], strides = [1, 1]} : vector<48x128xf32> to vector<8x128xf32>
    %19 = arith.maximumf %17, %18 : vector<8x128xf32>
    %20 = tpu.concatenate %13, %16, %19 in 0 : vector<8x128xf32>, vector<8x128xf32>, vector<8x128xf32> -> vector<24x128xf32>
    %c1 = arith.constant 1 : index
    %c0_7 = arith.constant 0 : index
    %c0_8 = arith.constant 0 : index
    %21 = vector.load %arg2[%c1, %c0_7, %c0_8] : memref<7x128x128xbf16, #tpu.memory_space<vmem>>, vector<1x128x128xbf16>
    %22 = vector.shape_cast %21 : vector<1x128x128xbf16> to vector<128x128xbf16>
    %c2 = arith.constant 2 : index
    %c0_9 = arith.constant 0 : index
    %c0_10 = arith.constant 0 : index
    %23 = vector.load %arg2[%c2, %c0_9, %c0_10] : memref<7x128x128xbf16, #tpu.memory_space<vmem>>, vector<1x128x128xbf16>
    %24 = vector.shape_cast %23 : vector<1x128x128xbf16> to vector<128x128xbf16>
    %c3 = arith.constant 3 : index
    %c0_11 = arith.constant 0 : index
    %c0_12 = arith.constant 0 : index
    %25 = vector.load %arg2[%c3, %c0_11, %c0_12] : memref<7x128x128xbf16, #tpu.memory_space<vmem>>, vector<1x128x128xbf16>
    %26 = vector.shape_cast %25 : vector<1x128x128xbf16> to vector<128x128xbf16>
    %27 = tpu.concatenate %22, %24, %26 in 0 : vector<128x128xbf16>, vector<128x128xbf16>, vector<128x128xbf16> -> vector<384x128xbf16>
    %28 = vector.extract_strided_slice %0 {offsets = [1, 0], sizes = [1, 128], strides = [1, 1]} : vector<8x128xf32> to vector<1x128xf32>
    %29 = vector.extract_strided_slice %20 {offsets = [0, 0], sizes = [8, 128], strides = [1, 1]} : vector<24x128xf32> to vector<8x128xf32>
    %30 = vector.extract_strided_slice %20 {offsets = [8, 0], sizes = [8, 128], strides = [1, 1]} : vector<24x128xf32> to vector<8x128xf32>
    %31 = vector.extract_strided_slice %20 {offsets = [16, 0], sizes = [8, 128], strides = [1, 1]} : vector<24x128xf32> to vector<8x128xf32>
    %32 = tpu.concatenate %29, %30, %31 in 1 : vector<8x128xf32>, vector<8x128xf32>, vector<8x128xf32> -> vector<8x384xf32>
    %33 = arith.truncf %32 : vector<8x384xf32> to vector<8x384xbf16>
    %cst_13 = arith.constant dense<0.000000e+00> : vector<8x128xf32>
    %34 = tpu.matmul %33, %27, %cst_13 {dimension_numbers = #tpu.dot_dimension_numbers<[1], [0], [0], [1], [0, 0, 1, 1], [], []>} : vector<8x384xbf16>, vector<384x128xbf16>, vector<8x128xf32> -> vector<8x128xf32>
    %35 = vector.broadcast %28 : vector<1x128xf32> to vector<8x128xf32>
    %36 = arith.addf %34, %35 : vector<8x128xf32>
    %cst_14 = arith.constant 0.000000e+00 : f32
    %37 = vector.broadcast %cst_14 : f32 to vector<8x128xf32>
    %38 = arith.maximumf %36, %37 : vector<8x128xf32>
    %39 = arith.truncf %38 : vector<8x128xf32> to vector<8x128xbf16>
    %c4 = arith.constant 4 : index
    %c0_15 = arith.constant 0 : index
    %c0_16 = arith.constant 0 : index
    %40 = vector.load %arg2[%c4, %c0_15, %c0_16] : memref<7x128x128xbf16, #tpu.memory_space<vmem>>, vector<1x128x128xbf16>
    %41 = vector.shape_cast %40 : vector<1x128x128xbf16> to vector<128x128xbf16>
    %cst_17 = arith.constant dense<0.000000e+00> : vector<8x128xf32>
    %42 = tpu.matmul %39, %41, %cst_17 {dimension_numbers = #tpu.dot_dimension_numbers<[1], [0], [0], [1], [0, 0, 1, 1], [], []>} : vector<8x128xbf16>, vector<128x128xbf16>, vector<8x128xf32> -> vector<8x128xf32>
    %43 = vector.extract_strided_slice %0 {offsets = [2, 0], sizes = [1, 128], strides = [1, 1]} : vector<8x128xf32> to vector<1x128xf32>
    %44 = vector.broadcast %43 : vector<1x128xf32> to vector<8x128xf32>
    %45 = arith.addf %42, %44 : vector<8x128xf32>
    %cst_18 = arith.constant 0.000000e+00 : f32
    %46 = vector.broadcast %cst_18 : f32 to vector<8x128xf32>
    %47 = arith.maximumf %45, %46 : vector<8x128xf32>
    %48 = arith.truncf %47 : vector<8x128xf32> to vector<8x128xbf16>
    %c5 = arith.constant 5 : index
    %c0_19 = arith.constant 0 : index
    %c0_20 = arith.constant 0 : index
    %49 = vector.load %arg2[%c5, %c0_19, %c0_20] : memref<7x128x128xbf16, #tpu.memory_space<vmem>>, vector<1x128x128xbf16>
    %50 = vector.shape_cast %49 : vector<1x128x128xbf16> to vector<128x128xbf16>
    %cst_21 = arith.constant dense<0.000000e+00> : vector<8x128xf32>
    %51 = tpu.matmul %48, %50, %cst_21 {dimension_numbers = #tpu.dot_dimension_numbers<[1], [0], [0], [1], [0, 0, 1, 1], [], []>} : vector<8x128xbf16>, vector<128x128xbf16>, vector<8x128xf32> -> vector<8x128xf32>
    %52 = vector.extract_strided_slice %0 {offsets = [3, 0], sizes = [1, 128], strides = [1, 1]} : vector<8x128xf32> to vector<1x128xf32>
    %53 = vector.broadcast %52 : vector<1x128xf32> to vector<8x128xf32>
    %54 = arith.addf %51, %53 : vector<8x128xf32>
    %cst_22 = arith.constant 0.000000e+00 : f32
    %55 = vector.broadcast %cst_22 : f32 to vector<8x128xf32>
    %56 = arith.maximumf %54, %55 : vector<8x128xf32>
    %57 = arith.truncf %56 : vector<8x128xf32> to vector<8x128xbf16>
    %c6 = arith.constant 6 : index
    %c0_23 = arith.constant 0 : index
    %c0_24 = arith.constant 0 : index
    %58 = vector.load %arg2[%c6, %c0_23, %c0_24] : memref<7x128x128xbf16, #tpu.memory_space<vmem>>, vector<1x128x128xbf16>
    %59 = vector.shape_cast %58 : vector<1x128x128xbf16> to vector<128x128xbf16>
    %cst_25 = arith.constant dense<0.000000e+00> : vector<8x128xf32>
    %60 = tpu.matmul %57, %59, %cst_25 {dimension_numbers = #tpu.dot_dimension_numbers<[1], [0], [0], [1], [0, 0, 1, 1], [], []>} : vector<8x128xbf16>, vector<128x128xbf16>, vector<8x128xf32> -> vector<8x128xf32>
    %61 = vector.extract_strided_slice %0 {offsets = [4, 0], sizes = [1, 128], strides = [1, 1]} : vector<8x128xf32> to vector<1x128xf32>
    %62 = vector.broadcast %61 : vector<1x128xf32> to vector<8x128xf32>
    %63 = arith.addf %60, %62 : vector<8x128xf32>
    %c0_26 = arith.constant 0 : index
    %c0_27 = arith.constant 0 : index
    %64 = vector.load %arg4[%c0_26, %c0_27] : memref<8x128xf32, #tpu.memory_space<vmem>>, vector<8x128xf32>
    tpu.vector_store %arg4[%c0_26, %c0_27], %63 {strides = array<i32>} : memref<8x128xf32, #tpu.memory_space<vmem>>, vector<8x128xf32>,
    return
  }
  func.func @transform_0(%arg0: i32) -> (i32, i32) {
    %c0_i32 = arith.constant 0 : i32
    %c0_i32_0 = arith.constant 0 : i32
    return %arg0, %c0_i32 : i32, i32
  }
  func.func @transform_1(%arg0: i32) -> (i32, i32, i32) {
    %c0_i32 = arith.constant 0 : i32
    %c0_i32_0 = arith.constant 0 : i32
    %c0_i32_1 = arith.constant 0 : i32
    %c0_i32_2 = arith.constant 0 : i32
    return %c0_i32, %c0_i32_0, %c0_i32_1 : i32, i32, i32
  }
  func.func @transform_2(%arg0: i32) -> (i32, i32) {
    %c0_i32 = arith.constant 0 : i32
    %c0_i32_0 = arith.constant 0 : i32
    %c0_i32_1 = arith.constant 0 : i32
    return %c0_i32, %c0_i32_0 : i32, i32
  }
  func.func @transform_3(%arg0: i32) -> (i32, i32) {
    %c0_i32 = arith.constant 0 : i32
    %c0_i32_0 = arith.constant 0 : i32
    return %arg0, %c0_i32 : i32, i32
  }
}

</mosaic_0001>

<bundles_post_ra>
// kernel: forward.1
= control target key start
LH: loop header
LB: loop body
LE: loop exit
PB: predicated region body
PF: predicated region fallthrough
CT: control target
= control target key end

     0   :  { %s1419_s12 = smov 0   ;;  %s1680_s0 = inlined_call_operand.vmem [shape: f32[96,128], index: 0, kind: input, shape index: {}]   ;;  %s1681_s1 = inlined_call_operand.vmem [shape: bf16[7,128,128], index: 1, kind: input, shape index: {}]   ;;  %s1682_s2 = inlined_call_operand.vmem [shape: f32[8,128], index: 2, kind: input, shape index: {}]   ;;  %s1683_s3 = inlined_call_operand.vmem [shape: f32[16,128], index: 3, kind: output, shape index: {}]  }
   0x1 LB: > { %s1425_s13 = sadd.s32 4294967295, %s1395_s12   ;;  %p989_p0 = scmp.ge.s32.totalorder %s1395_s12, 1  ;;  %s1395_s12 = sphi %s1419_s12, %s13_s12  }
   0x2   : > { %p138_p1 = scmp.lt.s32.totalorder %s1395_s12, 3 }
   0x4   : > { %p139_p2 = pnand %p989_p0, %p138_p1 }
   0x5   : > { %v1333_v0 = vld [vmem:[%s1681_s1] sm:$0xff] (!%p139_p2)   ;;  %v1397_v1 = vmov (!%p139_p2), 0.0   ;;  %v1334_v2 = vld [vmem:[%s1681_s1 + $0x8] sm:$0xff] (!%p139_p2)   ;;  %vm1398_vm0 = vmmov (!%p139_p2), 0   ;;  %s161_s18 = smul.u32 (!%p139_p2), 6, %s1425_s13  ;;  %v1335_v3 = vld [vmem:[%s1681_s1 + $0x10] sm:$0xff] (!%p139_p2)   ;;  %v198_v42 = vlaneseq (!%p139_p2) }
   0x6   : > { %142 = sbr.rel (%p139_p2) target bundleno = 1145 (0x479), region = 32  ;;  %1215 = vmatprep.subr.bf16.mxu0 (!%p139_p2), %v1397_v1  ;;  %1231 = vmatprep.mubr.msk.bf16.mxu0 (!%p139_p2), %vm1398_vm0, %v1397_v1  ;;  %v1341_v4 = vld [vmem:[%s1681_s1 + $0x80] sm:$0xff] (!%p139_p2)   ;;  %v1336_v6 = vld [vmem:[%s1681_s1 + $0x18] sm:$0xff] (!%p139_p2)   ;;  %v1343_v8 = vld [vmem:[%s1681_s1 + $0x88] sm:$0xff] (!%p139_p2)   ;;  %p167_p4 = scmp.lt.s32.totalorder (!%p139_p2), %s1425_s13, 1 }
   0x7   : > { %1216 = vmatpush3.bf16.msra.mxu0 (!%p139_p2), %v1333_v0  ;;  %p162_p3 = scmp.lt.s32.totalorder (!%p139_p2), %s161_s18, 11  ;;  %v1342_v5 = vld [vmem:[%s1681_s1 + $0x40] sm:$0xff] (!%p139_p2)   ;;  %1157 = vmatprep.subr.bf16.mxu1 (!%p139_p2), %v1341_v4  ;;  %v1344_v9 = vld [vmem:[%s1681_s1 + $0x48] sm:$0xff] (!%p139_p2)   ;;  %v1345_v10 = vld [vmem:[%s1681_s1 + $0x90] sm:$0xff] (!%p139_p2)   ;;  %v1555_v43 = vshrl.u32 (!%p139_p2), %v198_v42, 7 }
   0x8   : > { %1217 = vmatprep.subr.bf16.mxu0 (!%p139_p2), %v1397_v1  ;;  %1158 = vmatpush3.bf16.msra.mxu1 (!%p139_p2), %v1342_v5  ;;  %v1337_v7 = vld [vmem:[%s1681_s1 + $0x20] sm:$0xff] (!%p139_p2)   ;;  %v1347_v11 = vld [vmem:[%s1681_s1 + $0x50] sm:$0xff] (!%p139_p2)   ;;  %v1338_v12 = vld [vmem:[%s1681_s1 + $0x28] sm:$0xff] (!%p139_p2)  }
   0x9   : > { %1159 = vmatprep.subr.bf16.mxu1 (!%p139_p2), %v1343_v8  ;;  %v1339_v13 = vld [vmem:[%s1681_s1 + $0x30] sm:$0xff] (!%p139_p2)   ;;  %v1340_v14 = vld [vmem:[%s1681_s1 + $0x38] sm:$0xff] (!%p139_p2)   ;;  %v1346_v17 = vld [vmem:[%s1681_s1 + $0xc0] sm:$0xff] (!%p139_p2)   ;;  %v200_v44 = vsub.s32 (!%p139_p2), 0, %v1555_v43 }
   0xa   : > { %v1348_v25 = vld [vmem:[%s1681_s1 + $0x98] sm:$0xff] (!%p139_p2)   ;;  %v1349_v26 = vld [vmem:[%s1681_s1 + $0xc8] sm:$0xff] (!%p139_p2)   ;;  %v1351_v28 = vld [vmem:[%s1681_s1 + $0xa0] sm:$0xff] (!%p139_p2)  }
   0xb   : > { %1218 = vmatpush3.bf16.msra.mxu0 (!%p139_p2), %v1334_v2  ;;  %v1350_v27 = vld [vmem:[%s1681_s1 + $0x58] sm:$0xff] (!%p139_p2)   ;;  %v1352_v29 = vld [vmem:[%s1681_s1 + $0xd0] sm:$0xff] (!%p139_p2)   ;;  %v1353_v30 = vld [vmem:[%s1681_s1 + $0x60] sm:$0xff] (!%p139_p2)  }
   0xc   : > { %1219 = vmatprep.subr.bf16.mxu0 (!%p139_p2), %v1397_v1  ;;  %1160 = vmatpush3.bf16.msra.mxu1 (!%p139_p2), %v1344_v9  ;;  %v1354_v31 = vld [vmem:[%s1681_s1 + $0xa8] sm:$0xff] (!%p139_p2)   ;;  %v1355_v32 = vld [vmem:[%s1681_s1 + $0xd8] sm:$0xff] (!%p139_p2)   ;;  %v1357_v34 = vld [vmem:[%s1681_s1 + $0xb0] sm:$0xff] (!%p139_p2)  }
   0xd   : > { %s1685_s18 = smov (!%p162_p3, %s161_s18), 11  ;;  %1161 = vmatprep.subr.bf16.mxu1 %v1345_v10  ;;  %v1356_v33 = vld [vmem:[%s1681_s1 + $0x68] sm:$0xff]   ;;  %v1358_v35 = vld [vmem:[%s1681_s1 + $0xe0] sm:$0xff]   ;;  %v1359_v36 = vld [vmem:[%s1681_s1 + $0x70] sm:$0xff]   ;;  %s1687_s13 = smov (!%p167_p4, %s1425_s13), 1 }
   0xe   : > { %s990_s14 = sshll.u32 %s1685_s18, 3  ;;  %v1360_v37 = vld [vmem:[%s1681_s1 + $0xb8] sm:$0xff]   ;;  %v1361_v38 = vld [vmem:[%s1681_s1 + $0xe8] sm:$0xff]   ;;  %v1363_v40 = vld [vmem:[%s1681_s1 + $0xf0] sm:$0xff]   ;;  %s991_s6 = sshll.u32 %s1687_s13, 3 }
   0xf   : > { %1220 = vmatpush3.bf16.msra.mxu0 %v1335_v3  ;;  %s165_s20 = scalar_lea.vmem %s1680_s0, %s990_s14  ;;  %v1362_v39 = vld [vmem:[%s1681_s1 + $0x78] sm:$0xff]   ;;  %v1561_v45 = vld [vmem:[%s1682_s2] sm:$0xff]  ;;  %s170_s9 = scalar_lea.vmem %s1683_s3, %s991_s6 }
  0x10   : > { %1221 = vmatprep.subr.bf16.mxu0 %v1397_v1  ;;  %1162 = vmatpush3.bf16.msra.mxu1 %v1347_v11  ;;  %v173_v15 = vld [vmem:[%s165_s20] sm:$0xff]  ;;  %v174_v16 = vld [vmem:[%s165_s20 + $0x8] sm:$0xff]  ;;  %v175_v19 = vld [vmem:[%s165_s20 + $0x10] sm:$0xff]  ;;  %v201_v46 = vrot.slane %v1561_v45, %v200_v44 }
  0x11   : > { %v179_v18 = vpack.c.bf16 %v174_v16, %v173_v15  ;;  %v176_v20 = vld [vmem:[%s165_s20 + $0x18] sm:$0xff]  ;;  %v177_v22 = vld [vmem:[%s165_s20 + $0x20] sm:$0xff]  ;;  %v178_v23 = vld [vmem:[%s165_s20 + $0x28] sm:$0xff]  ;;  %1163 = vmatprep.subr.bf16.mxu1 %v1348_v25 }
  0x12   : > { %v180_v21 = vpack.c.bf16 %v176_v20, %v175_v19  ;;  %v181_v24 = vpack.c.bf16 %v178_v23, %v177_v22  ;;  %v1364_v41 = vld [vmem:[%s1681_s1 + $0xf8] sm:$0xff]   ;;  %v1367_v16 = vld [vmem:[%s1681_s1 + $0x110] sm:$0xff]   ;;  %v1370_v19 = vld [vmem:[%s1681_s1 + $0x128] sm:$0xff]  }
  0x13   : > { %1222 = vmatpush3.bf16.msra.mxu0 %v1336_v6  ;;  %v1365_v6 = vld [vmem:[%s1681_s1 + $0x100] sm:$0xff]   ;;  %v1371_v20 = vld [vmem:[%s1681_s1 + $0x130] sm:$0xff]   ;;  %v1374_v23 = vld [vmem:[%s1681_s1 + $0x148] sm:$0xff]  }
  0x14   : > { %1223 = vmatprep.subr.bf16.mxu0 %v1397_v1  ;;  %1164 = vmatpush3.bf16.msra.mxu1 %v1350_v27  ;;  %v1373_v22 = vld [vmem:[%s1681_s1 + $0x140] sm:$0xff]   ;;  %v1376_v25 = vld [vmem:[%s1681_s1 + $0x158] sm:$0xff]   ;;  %v1378_v27 = vld [vmem:[%s1681_s1 + $0x168] sm:$0xff]  }
  0x15   : > { %1165 = vmatprep.subr.bf16.mxu1 %v1351_v28  ;;  %v516_v28 = vsub.s32 1, %v1555_v43  ;;  %v1379_v44 = vld [vmem:[%s1681_s1 + $0x170] sm:$0xff]  }
  0x17   : > { %1224 = vmatpush3.bf16.msra.mxu0 %v1337_v7 }
  0x18   : > { %1225 = vmatprep.subr.bf16.mxu0 %v1397_v1  ;;  %1166 = vmatpush3.bf16.msra.mxu1 %v1353_v30 }
  0x19   : > { %1167 = vmatprep.subr.bf16.mxu1 %v1354_v31 }
  0x1b   : > { %1226 = vmatpush3.bf16.msra.mxu0 %v1338_v12 }
  0x1c   : > { %1227 = vmatprep.subr.bf16.mxu0 %v1397_v1  ;;  %1168 = vmatpush3.bf16.msra.mxu1 %v1356_v33  ;;  %v517_v33 = vrot.slane %v1561_v45, %v516_v28 }
  0x1d   : > { %1169 = vmatprep.subr.bf16.mxu1 %v1357_v34 }
  0x1f   : > { %1228 = vmatpush3.bf16.msra.mxu0 %v1339_v13  ;;  %v1366_v13 = vld [vmem:[%s1681_s1 + $0x108] sm:$0xff]  }
  0x20   : > { %1229 = vmatprep.subr.bf16.mxu0 %v1397_v1  ;;  %1170 = vmatpush3.bf16.msra.mxu1 %v1359_v36 }
  0x21   : > { %1171 = vmatprep.subr.bf16.mxu1 %v1360_v37 }
  0x23   : > { %1230 = vmatpush3.bf16.msra.mxu0 %v1340_v14 }
  0x24   : > { %1243 = vmatprep.subr.bf16.mxu0 %v1397_v1  ;;  %1172 = vmatpush3.bf16.msra.mxu1 %v1362_v39 }
  0x25   : > { %1263 = vmatprep.subr.bf16.mxu1 %v1397_v1 }
  0x26   : > { %1232 = vmatmul.mubr.bf16.vlgmr.msra.gmra.mrb[0].mxu0 %v179_v18  ;;  %v1369_v18 = vld [vmem:[%s1681_s1 + $0x120] sm:$0xff]  }
  0x27   : > { %1235 = vmatprep.mubr.msk.bf16.mxu0 %vm1398_vm0, %v1397_v1  ;;  %1244 = vmatpush3.bf16.msra.mxu0 %v1346_v17  ;;  %v1368_v17 = vld [vmem:[%s1681_s1 + $0x118] sm:$0xff]  }
  0x28   : > { %1245 = vmatprep.subr.bf16.mxu0 %v1397_v1 }
  0x2b   : > { %1246 = vmatpush3.bf16.msra.mxu0 %v1349_v26  ;;  %v1377_v26 = vld [vmem:[%s1681_s1 + $0x160] sm:$0xff]  }
  0x2c   : > { %1247 = vmatprep.subr.bf16.mxu0 %v1397_v1 }
  0x2e   : > { %1236 = vmatmul.mubr.bf16.gmra.mrb[4].mxu0 %v180_v21  ;;  %v1372_v21 = vld [vmem:[%s1681_s1 + $0x138] sm:$0xff]  }
  0x2f   : > { %1239 = vmatprep.mubr.msk.bf16.mxu0 %vm1398_vm0, %v1397_v1  ;;  %1248 = vmatpush3.bf16.msra.mxu0 %v1352_v29 }
  0x30   : > { %1249 = vmatprep.subr.bf16.mxu0 %v1397_v1 }
  0x33   : > { %1250 = vmatpush3.bf16.msra.mxu0 %v1355_v32 }
  0x34   : > { %1251 = vmatprep.subr.bf16.mxu0 %v1397_v1 }
  0x36   : > { %1240 = vmatmul.mubr.bf16.gmra.mrb[8].mxu0 %v181_v24  ;;  %v1375_v24 = vld [vmem:[%s1681_s1 + $0x150] sm:$0xff]  }
  0x37   : > { %1259 = vmatprep.mubr.msk.bf16.mxu0 %vm1398_vm0, %v1397_v1  ;;  %1252 = vmatpush3.bf16.msra.mxu0 %v1358_v35 }
  0x38   : > { %1253 = vmatprep.subr.bf16.mxu0 %v1397_v1 }
  0x3b   : > { %1254 = vmatpush3.bf16.msra.mxu0 %v1361_v38 }
  0x3c   : > { %1255 = vmatprep.subr.bf16.mxu0 %v1397_v1 }
  0x3f   : > { %1256 = vmatpush3.bf16.msra.mxu0 %v1363_v40 }
  0x40   : > { %1257 = vmatprep.subr.bf16.mxu0 %v1397_v1 }
  0x43   : > { %1258 = vmatpush3.bf16.msra.mxu0 %v1364_v41 }
  0x44   : > { %1283 = vmatprep.subr.bf16.mxu0 %v1397_v1 }
  0xf9   : > { %v284_v47 = vpop.f32.mrb[0].mxu0 }
  0xfa   : > { %v285_v48 = vadd.f32 %v284_v47, %v201_v46  ;;  %v1233_v49 = vpop.f32.mrb[1].mxu0  ;;  %v1381_v47 = vld [vmem:[%s1681_s1 + $0x180] sm:$0xff]  }
  0xfb   : > { %v287_v50 = vpop.f32.mrb[2].mxu0  ;;  %v1383_v49 = vld [vmem:[%s1681_s1 + $0x190] sm:$0xff]  }
  0xfc   : > { %v288_v51 = vadd.f32 %v287_v50, %v201_v46  ;;  %v1234_v52 = vpop.f32.mrb[3].mxu0  ;;  %v307_v53 = vmax.f32 %v285_v48, 0.0  ;;  %v1382_v48 = vld [vmem:[%s1681_s1 + $0x188] sm:$0xff]   ;;  %v1384_v50 = vld [vmem:[%s1681_s1 + $0x198] sm:$0xff]  }
  0xfd   : > { %v1386_v52 = vld [vmem:[%s1681_s1 + $0x1a8] sm:$0xff]  }
  0xfe   : > { %v308_v54 = vmax.f32 %v288_v51, 0.0  ;;  %v1385_v51 = vld [vmem:[%s1681_s1 + $0x1a0] sm:$0xff]  }
 0x100   : > { %v313_v55 = vmax.f32 %v307_v53, %v308_v54  ;;  %v619_v53 = vsub.s32 2, %v1555_v43 }
 0x101   : > { %v292_v56 = vpop.f32.mrb[4].mxu0 }
 0x102   : > { %v293_v57 = vadd.f32 %v292_v56, %v201_v46  ;;  %v1237_v58 = vpop.f32.mrb[5].mxu0  ;;  %v511_v7 = vpack.c.bf16 %v313_v55, %v313_v55  ;;  %v620_v54 = vrot.slane %v1561_v45, %v619_v53 }
 0x103   : > { %v295_v59 = vpop.f32.mrb[6].mxu0 }
 0x104   : > { %v296_v60 = vadd.f32 %v295_v59, %v201_v46  ;;  %v1238_v61 = vpop.f32.mrb[7].mxu0  ;;  %v309_v62 = vmax.f32 %v293_v57, 0.0 }
 0x106   : > { %v310_v63 = vmax.f32 %v296_v60, 0.0 }
 0x108   : > { %v314_v0 = vmax.f32 %v309_v62, %v310_v63  ;;  %v1387_v62 = vld [vmem:[%s1681_s1 + $0x1b0] sm:$0xff]   ;;  %v1388_v63 = vld [vmem:[%s1681_s1 + $0x1b8] sm:$0xff]  }
 0x109   : > { %v300_v2 = vpop.f32.mrb[8].mxu0 }
 0x10a   : > { %v301_v3 = vadd.f32 %v300_v2, %v201_v46  ;;  %v1241_v4 = vpop.f32.mrb[9].mxu0  ;;  %v512_v5 = vpack.c.bf16 %v314_v0, %v314_v0  ;;  %v730_v0 = vsub.s32 3, %v1555_v43 }
 0x10b   : > { %v303_v8 = vpop.f32.mrb[10].mxu0 }
 0x10c   : > { %v304_v9 = vadd.f32 %v303_v8, %v201_v46  ;;  %v1242_v10 = vpop.f32.mrb[11].mxu0  ;;  %550 = vmatprep.mubr.bf16.mxu1 %v512_v5  ;;  %v311_v11 = vmax.f32 %v301_v3, 0.0  ;;  %v1380_v46 = vld [vmem:[%s1681_s1 + $0x178] sm:$0xff]   ;;  %v731_v2 = vrot.slane %v1561_v45, %v730_v0 }
 0x10d   : > { %551 = vmatmul.mubr.bf16.vlgmr.msra.gmra.mrb[0].mxu1 %v511_v7 }
 0x10e   : > { %v312_v12 = vmax.f32 %v304_v9, 0.0  ;;  %1264 = vmatpush3.bf16.msra.mxu1 %v1365_v6  ;;  %1279 = vmatprep.mubr.msk.bf16.mxu1 %vm1398_vm0, %v1397_v1 }
 0x10f   : > { %1265 = vmatprep.subr.bf16.mxu1 %v1397_v1 }
 0x110   : > { %v315_v14 = vmax.f32 %v311_v11, %v312_v12 }
 0x112   : > { %v513_v15 = vpack.c.bf16 %v315_v14, %v315_v14  ;;  %1266 = vmatpush3.bf16.msra.mxu1 %v1366_v13 }
 0x113   : > { %1267 = vmatprep.subr.bf16.mxu1 %v1397_v1 }
 0x114   : > { %1260 = vmatmul.mubr.bf16.vlgmr.msra.gmra.mrb[12].mxu0 %v513_v15 }
 0x115   : > { %1299 = vmatprep.mubr.msk.bf16.mxu0 %vm1398_vm0, %v1397_v1  ;;  %1284 = vmatpush3.bf16.msra.mxu0 %v1373_v22 }
 0x116   : > { %1268 = vmatpush3.bf16.msra.mxu1 %v1367_v16  ;;  %1285 = vmatprep.subr.bf16.mxu0 %v1397_v1 }
 0x117   : > { %1269 = vmatprep.subr.bf16.mxu1 %v1397_v1 }
 0x119   : > { %1286 = vmatpush3.bf16.msra.mxu0 %v1374_v23 }
 0x11a   : > { %1270 = vmatpush3.bf16.msra.mxu1 %v1368_v17  ;;  %1287 = vmatprep.subr.bf16.mxu0 %v1397_v1 }
 0x11b   : > { %1271 = vmatprep.subr.bf16.mxu1 %v1397_v1 }
 0x11d   : > { %1288 = vmatpush3.bf16.msra.mxu0 %v1375_v24 }
 0x11e   : > { %1272 = vmatpush3.bf16.msra.mxu1 %v1369_v18  ;;  %1289 = vmatprep.subr.bf16.mxu0 %v1397_v1 }
 0x11f   : > { %1273 = vmatprep.subr.bf16.mxu1 %v1397_v1 }
 0x121   : > { %1290 = vmatpush3.bf16.msra.mxu0 %v1376_v25 }
 0x122   : > { %1274 = vmatpush3.bf16.msra.mxu1 %v1370_v19  ;;  %1291 = vmatprep.subr.bf16.mxu0 %v1397_v1 }
 0x123   : > { %1275 = vmatprep.subr.bf16.mxu1 %v1397_v1 }
 0x125   : > { %1292 = vmatpush3.bf16.msra.mxu0 %v1377_v26 }
 0x126   : > { %1276 = vmatpush3.bf16.msra.mxu1 %v1371_v20  ;;  %1293 = vmatprep.subr.bf16.mxu0 %v1397_v1 }
 0x127   : > { %1277 = vmatprep.subr.bf16.mxu1 %v1397_v1 }
 0x129   : > { %1294 = vmatpush3.bf16.msra.mxu0 %v1378_v27 }
 0x12a   : > { %1278 = vmatpush3.bf16.msra.mxu1 %v1372_v21  ;;  %1295 = vmatprep.subr.bf16.mxu0 %v1397_v1 }
 0x12b   : > { %1303 = vmatprep.subr.bf16.mxu1 %v1397_v1 }
 0x12d   : > { %1296 = vmatpush3.bf16.msra.mxu0 %v1379_v44 }
 0x12e   : > { %1297 = vmatprep.subr.bf16.mxu0 %v1397_v1 }
 0x131   : > { %1298 = vmatpush3.bf16.msra.mxu0 %v1380_v46 }
 0x1e0   : > { %v1173_v29 = vpop.f32.mrb[0].mxu1 }
 0x1e1   : > { %v1174_v30 = vpop.f32.mrb[1].mxu1 }
 0x1e2   : > { %v1175_v31 = vadd.f32 %v1174_v30, %v1173_v29  ;;  %v1176_v32 = vpop.f32.mrb[2].mxu1 }
 0x1e3   : > { %v1177_v34 = vpop.f32.mrb[3].mxu1 }
 0x1e4   : > { %v553_v35 = vadd.f32 %v1175_v31, %v517_v33 }
 0x1e7   : > { %v592_v36 = vpop.f32.mrb[12].mxu0 }
 0x1e8   : > { %v593_v37 = vadd.f32 %v592_v36, %v553_v35  ;;  %v1261_v38 = vpop.f32.mrb[13].mxu0 }
 0x1e9   : > { %v595_v39 = vpop.f32.mrb[14].mxu0 }
 0x1ea   : > { %v598_v40 = vmax.f32 %v593_v37, 0.0  ;;  %v1262_v41 = vpop.f32.mrb[15].mxu0 }
 0x1ec   : > { %v599_v42 = vpack.c.bf16 %v598_v40, %v598_v40 }
 0x1ee   : > { %1280 = vmatmul.mubr.bf16.vlgmr.msra.gmra.mrb[4].mxu1 %v599_v42 }
 0x1ef   : > { %1319 = vmatprep.mubr.msk.bf16.mxu1 %vm1398_vm0, %v1397_v1  ;;  %1304 = vmatpush3.bf16.msra.mxu1 %v1381_v47 }
 0x1f0   : > { %1305 = vmatprep.subr.bf16.mxu1 %v1397_v1 }
 0x1f3   : > { %1306 = vmatpush3.bf16.msra.mxu1 %v1382_v48 }
 0x1f4   : > { %1307 = vmatprep.subr.bf16.mxu1 %v1397_v1 }
 0x1f7   : > { %1308 = vmatpush3.bf16.msra.mxu1 %v1383_v49 }
 0x1f8   : > { %1309 = vmatprep.subr.bf16.mxu1 %v1397_v1 }
 0x1fb   : > { %1310 = vmatpush3.bf16.msra.mxu1 %v1384_v50 }
 0x1fc   : > { %1311 = vmatprep.subr.bf16.mxu1 %v1397_v1 }
 0x1ff   : > { %1312 = vmatpush3.bf16.msra.mxu1 %v1385_v51 }
 0x200   : > { %1313 = vmatprep.subr.bf16.mxu1 %v1397_v1 }
 0x203   : > { %1314 = vmatpush3.bf16.msra.mxu1 %v1386_v52 }
 0x204   : > { %1315 = vmatprep.subr.bf16.mxu1 %v1397_v1 }
 0x207   : > { %1316 = vmatpush3.bf16.msra.mxu1 %v1387_v62 }
 0x208   : > { %1317 = vmatprep.subr.bf16.mxu1 %v1397_v1  ;;  %v841_v1 = vsub.s32 4, %v1555_v43 }
 0x20a   : > { %v842_v10 = vrot.slane %v1561_v45, %v841_v1 }
 0x20b   : > { %1318 = vmatpush3.bf16.msra.mxu1 %v1388_v63 }
 0x2c1   : > { %v703_v55 = vpop.f32.mrb[4].mxu1 }
 0x2c2   : > { %v704_v56 = vadd.f32 %v703_v55, %v620_v54  ;;  %v1281_v57 = vpop.f32.mrb[5].mxu1 }
 0x2c3   : > { %v706_v58 = vpop.f32.mrb[6].mxu1 }
 0x2c4   : > { %v709_v59 = vmax.f32 %v704_v56, 0.0  ;;  %v1282_v60 = vpop.f32.mrb[7].mxu1 }
 0x2c6   : > { %v710_v61 = vpack.c.bf16 %v709_v59, %v709_v59 }
 0x2c8   : > { %1300 = vmatmul.mubr.bf16.vlgmr.msra.gmra.mrb[16].mxu0 %v710_v61 }
 0x39b   : > { %v814_v3 = vpop.f32.mrb[16].mxu0 }
 0x39c   : > { %v815_v4 = vadd.f32 %v814_v3, %v731_v2  ;;  %v1301_v5 = vpop.f32.mrb[17].mxu0 }
 0x39d   : > { %v817_v6 = vpop.f32.mrb[18].mxu0 }
 0x39e   : > { %v820_v7 = vmax.f32 %v815_v4, 0.0  ;;  %v1302_v8 = vpop.f32.mrb[19].mxu0 }
 0x3a0   : > { %v821_v9 = vpack.c.bf16 %v820_v7, %v820_v7 }
 0x3a2   : > { %1320 = vmatmul.mubr.bf16.vlgmr.msra.gmra.mrb[8].mxu1 %v821_v9 }
 0x475   : > { %v925_v11 = vpop.f32.mrb[8].mxu1 }
 0x476   : > { %v926_v12 = vadd.f32 %v925_v11, %v842_v10  ;;  %v1321_v13 = vpop.f32.mrb[9].mxu1 }
 0x477   : > { %v928_v14 = vpop.f32.mrb[10].mxu1 }
 0x478   : > { %931 = vst [vmem:[%s170_s9] sm:$0xff] %v926_v12  ;;  %v1322_v15 = vpop.f32.mrb[11].mxu1 }
 0x479 PF: > { %s13_s12 = sadd.s32 1, %s1395_s12  }
 0x47a   : > { %p10_p5 = scmp.ge.s32.totalorder %s13_s12, 4  }
 0x47c   :  { %12 = sbr.rel (!%p10_p5) target bundleno = 1 (0x1), region = 68 }

</bundles_post_ra>
